<compile_context>
chip_gen: v7x
topology: tpu7x:2x2x1
jax: 0.10.0
libtpu: 0.0.40
codegen_flags: <defaults>
</compile_context>

<pallas_src>
import functools

import jax
import jax.numpy as jnp
from jax.experimental import pallas as pl
from jax.experimental.pallas import tpu as pltpu

NH = 20        # hidden width from the PyTorch module
NH_PAD = 32    # zero-padded hidden width (clean sublane layout, MXU-friendly)


def mlp_kernel(x_ref, w1_ref, b1_ref, w2_ref, b2_ref, w3_ref, b3_ref,
               w4_ref, b4_ref, w5_ref, b5_ref, out_ref, *, n_valid):
    pi = pl.program_id(0)          # parallel split (megacore axis on v7x)
    ti = pl.program_id(1)          # reduction axis over batch tiles
    nt = pl.num_programs(1)

    # Zero the resident per-lane accumulator at the start of each split.
    @pl.when(ti == 0)
    def _():
        out_ref[...] = jnp.zeros_like(out_ref)

    x = x_ref[...]                                        # (1, TN), lane-dense

    # Layer 1: Linear(1, nh) + Tanh.  K == 1 -> broadcast outer product (VPU).
    h = jnp.tanh(w1_ref[...] * x + b1_ref[...])           # (NH_PAD, TN)

    # Layers 2-4: Linear(nh, nh) + Tanh.  Keep on the MXU, f32 accumulation.
    h = jnp.tanh(jnp.dot(w2_ref[...], h,
                         preferred_element_type=jnp.float32) + b2_ref[...])
    h = jnp.tanh(jnp.dot(w3_ref[...], h,
                         preferred_element_type=jnp.float32) + b3_ref[...])
    h = jnp.tanh(jnp.dot(w4_ref[...], h,
                         preferred_element_type=jnp.float32) + b4_ref[...])

    # Layer 5: Linear(nh, 1) + ReLU -> lane-dense (1, TN) row.
    y = jnp.dot(w5_ref[...], h,
                preferred_element_type=jnp.float32) + b5_ref[...]   # (1, TN)
    y = jnp.maximum(y, 0.0)

    # Mask out padded batch columns (ragged last tile) before accumulating,
    # so the mean over the true batch size stays exact.
    tn = y.shape[-1]
    col = jax.lax.broadcasted_iota(jnp.int32, y.shape, 1)
    gcol = (pi * nt + ti) * tn + col
    y = jnp.where(gcol < n_valid, y, 0.0)

    # Per-lane partial sums; cross-lane reduce + divide-by-N happens once
    # in the wrapper (keeps the per-step critical path free of XLU reduces
    # and sub-128-lane stores).
    out_ref[...] += y


def _round_up(v, m):
    return ((v + m - 1) // m) * m


def init_params(key):
    """Deterministic init matching nn.Linear: weight (out,in), bias (out,)."""
    ks = jax.random.split(key, 10)

    def lin(kw, kb, fan_in, fan_out):
        bound = 1.0 / (fan_in ** 0.5)
        w = jax.random.uniform(kw, (fan_out, fan_in), jnp.float32, -bound, bound)
        b = jax.random.uniform(kb, (fan_out,), jnp.float32, -bound, bound)
        return w, b

    w1, b1 = lin(ks[0], ks[1], 1, NH)
    w2, b2 = lin(ks[2], ks[3], NH, NH)
    w3, b3 = lin(ks[4], ks[5], NH, NH)
    w4, b4 = lin(ks[6], ks[7], NH, NH)
    w5, b5 = lin(ks[8], ks[9], NH, 1)
    return (w1, b1, w2, b2, w3, b3, w4, b4, w5, b5)


def prepare_params(torch_params):
    """Zero-pad PyTorch-layout params to NH_PAD; biases become columns."""
    (w1, b1, w2, b2, w3, b3, w4, b4, w5, b5) = torch_params

    def pad2d(a, shape):
        out = jnp.zeros(shape, jnp.float32)
        return out.at[:a.shape[0], :a.shape[1]].set(a.astype(jnp.float32))

    w1p = pad2d(w1, (NH_PAD, 1))
    b1p = pad2d(b1.reshape(-1, 1), (NH_PAD, 1))
    w2p = pad2d(w2, (NH_PAD, NH_PAD))
    b2p = pad2d(b2.reshape(-1, 1), (NH_PAD, 1))
    w3p = pad2d(w3, (NH_PAD, NH_PAD))
    b3p = pad2d(b3.reshape(-1, 1), (NH_PAD, 1))
    w4p = pad2d(w4, (NH_PAD, NH_PAD))
    b4p = pad2d(b4.reshape(-1, 1), (NH_PAD, 1))
    w5p = pad2d(w5, (1, NH_PAD))
    b5p = jnp.asarray(b5, jnp.float32).reshape(1, 1)
    return (w1p, b1p, w2p, b2p, w3p, b3p, w4p, b4p, w5p, b5p)


def neural_network_forward(x, padded_params, *, tile_n=2048, num_parallel=2):
    """x: scalar or (N,) float32. Returns shape (1,) like the PyTorch module."""
    x = jnp.asarray(x, jnp.float32).reshape(-1)
    n = int(x.shape[0])

    # Lane-dense batch tile (multiple of 128), no larger than needed.
    # tile_n=2048 keeps live f32 intermediates well under 32 MiB scoped VMEM
    # on every generation (v7x included); raise it on v6e for huge batches.
    tile_n = max(128, min(int(tile_n), _round_up(n, 128)))
    n_tiles = -(-n // tile_n)
    p = max(1, min(int(num_parallel), n_tiles))   # megacore splits (v7x)
    t = -(-n_tiles // p)                          # batch tiles per split
    total = p * t * tile_n

    x_pad = jnp.zeros((total,), jnp.float32).at[:n].set(x)
    x_row = x_pad.reshape(1, total)               # (1, total): lane-dense rows

    params = padded_params
    # Weights/biases: full-array blocks with a constant block index -> DMA'd
    # once and kept resident in VMEM across all grid steps.
    weight_specs = [pl.BlockSpec(w.shape, lambda pi, ti: (0, 0)) for w in params]

    kernel = functools.partial(mlp_kernel, n_valid=n)

    cost = pl.CostEstimate(
        flops=total * (6 * NH_PAD * NH_PAD + 8 * NH_PAD),
        transcendentals=4 * total * NH_PAD,
        bytes_accessed=4 * (total + p * tile_n
                            + sum(int(w.size) for w in params)),
    )

    partial_sums = pl.pallas_call(
        kernel,
        out_shape=jax.ShapeDtypeStruct((1, p * tile_n), jnp.float32),
        grid_spec=pltpu.PrefetchScalarGridSpec(
            num_scalar_prefetch=0,
            grid=(p, t),
            in_specs=[pl.BlockSpec((1, tile_n),
                                   lambda pi, ti: (0, pi * t + ti))]
                     + weight_specs,
            out_specs=pl.BlockSpec((1, tile_n), lambda pi, ti: (0, pi)),
        ),
        compiler_params=pltpu.CompilerParams(
            dimension_semantics=("parallel", "arbitrary"),
            vmem_limit_bytes=32 * 1024 * 1024,
        ),
        cost_estimate=cost,
    )(x_row, *params)

    # Tiny cross-lane reduce + mean, done once in XLA.
    return (jnp.sum(partial_sums) / jnp.float32(n)).reshape(1)


def reference_forward(x, torch_params):
    """Pure-JAX reference with PyTorch nn.Linear semantics."""
    (w1, b1, w2, b2, w3, b3, w4, b4, w5, b5) = torch_params
    xc = jnp.asarray(x, jnp.float32).reshape(-1, 1)
    h = jnp.tanh(xc @ w1.T + b1)
    h = jnp.tanh(h @ w2.T + b2)
    h = jnp.tanh(h @ w3.T + b3)
    h = jnp.tanh(h @ w4.T + b4)
    y = jnp.maximum(h @ w5.T + b5, 0.0)
    return jnp.mean(y, axis=0).reshape(1)


if __name__ == "__main__":
    key = jax.random.PRNGKey(0)
    k_param, k_x = jax.random.split(key)
    torch_params = init_params(k_param)
    padded_params = prepare_params(torch_params)

    # Small batch of scalars (like np.linspace(0.01, 1, n) in the original),
    # with a little deterministic jitter.
    n = 300
    x = jnp.linspace(0.01, 1.0, num=n, dtype=jnp.float32)
    x = x + 0.01 * jax.random.uniform(k_x, (n,), jnp.float32)

    # tile_n=128 / num_parallel=2 so the small demo exercises the tiled
    # accumulating reduction, the parallel split axis and ragged-tile masking.
    out = neural_network_forward(x, padded_params, tile_n=128, num_parallel=2)
    out = jax.block_until_ready(out)

    ref = reference_forward(x, torch_params)
    assert out.shape == (1,)
    assert jnp.allclose(out, ref, atol=2e-5, rtol=2e-5), (out, ref)
    print("KERNEL_OK")
</pallas_src>

<mosaic_0001>
module attributes {stable_mosaic.version = 11 : i64} {
  func.func @mlp_kernel(%arg0: i32, %arg1: i32, %arg2: memref<1x128xf32, #tpu.memory_space<vmem>>, %arg3: memref<32x1xf32, #tpu.memory_space<vmem>>, %arg4: memref<32x1xf32, #tpu.memory_space<vmem>>, %arg5: memref<32x32xf32, #tpu.memory_space<vmem>>, %arg6: memref<32x1xf32, #tpu.memory_space<vmem>>, %arg7: memref<32x32xf32, #tpu.memory_space<vmem>>, %arg8: memref<32x1xf32, #tpu.memory_space<vmem>>, %arg9: memref<32x32xf32, #tpu.memory_space<vmem>>, %arg10: memref<32x1xf32, #tpu.memory_space<vmem>>, %arg11: memref<1x32xf32, #tpu.memory_space<vmem>>, %arg12: memref<1x1xf32, #tpu.memory_space<vmem>>, %arg13: memref<1x128xf32, #tpu.memory_space<vmem>>) attributes {dimension_semantics = [#tpu.dimension_semantics<parallel>, #tpu.dimension_semantics<arbitrary>], iteration_bounds = array<i64: 2, 2>, scalar_prefetch = 0 : i64, scratch_operands = 0 : i64, tpu.core_type = #tpu.core_type<tc>, window_params = [{transform_indices = @transform_0, window_bounds = array<i64: 1, 128>}, {pipeline_mode = #tpu.pipeline_mode<synchronous>, transform_indices = @transform_1, window_bounds = array<i64: 32, 1>}, {pipeline_mode = #tpu.pipeline_mode<synchronous>, transform_indices = @transform_2, window_bounds = array<i64: 32, 1>}, {pipeline_mode = #tpu.pipeline_mode<synchronous>, transform_indices = @transform_3, window_bounds = array<i64: 32, 32>}, {pipeline_mode = #tpu.pipeline_mode<synchronous>, transform_indices = @transform_4, window_bounds = array<i64: 32, 1>}, {pipeline_mode = #tpu.pipeline_mode<synchronous>, transform_indices = @transform_5, window_bounds = array<i64: 32, 32>}, {pipeline_mode = #tpu.pipeline_mode<synchronous>, transform_indices = @transform_6, window_bounds = array<i64: 32, 1>}, {pipeline_mode = #tpu.pipeline_mode<synchronous>, transform_indices = @transform_7, window_bounds = array<i64: 32, 32>}, {pipeline_mode = #tpu.pipeline_mode<synchronous>, transform_indices = @transform_8, window_bounds = array<i64: 32, 1>}, {pipeline_mode = #tpu.pipeline_mode<synchronous>, transform_indices = @transform_9, window_bounds = array<i64: 1, 32>}, {pipeline_mode = #tpu.pipeline_mode<synchronous>, transform_indices = @transform_10, window_bounds = array<i64: 1, 1>}, {transform_indices = @transform_11, window_bounds = array<i64: 1, 128>}]} {
    %c0_i32 = arith.constant 0 : i32
    %0 = arith.cmpi eq, %arg1, %c0_i32 : i32
    %1 = arith.extui %0 : i1 to i32
    %c0_i32_0 = arith.constant 0 : i32
    %2 = arith.cmpi ne, %1, %c0_i32_0 : i32
    scf.if %2 {
      %cst_31 = arith.constant 0.000000e+00 : f32
      %50 = vector.broadcast %cst_31 : f32 to vector<1x128xf32>
      %c0_32 = arith.constant 0 : index
      %c0_33 = arith.constant 0 : index
      %51 = vector.load %arg13[%c0_32, %c0_33] : memref<1x128xf32, #tpu.memory_space<vmem>>, vector<1x128xf32>
      tpu.vector_store %arg13[%c0_32, %c0_33], %50 {strides = array<i32>} : memref<1x128xf32, #tpu.memory_space<vmem>>, vector<1x128xf32>,
    } else {
    }
    %c0 = arith.constant 0 : index
    %c0_1 = arith.constant 0 : index
    %3 = vector.load %arg2[%c0, %c0_1] : memref<1x128xf32, #tpu.memory_space<vmem>>, vector<1x128xf32>
    %c0_2 = arith.constant 0 : index
    %c0_3 = arith.constant 0 : index
    %4 = vector.load %arg3[%c0_2, %c0_3] : memref<32x1xf32, #tpu.memory_space<vmem>>, vector<32x1xf32>
    %5 = vector.broadcast %4 : vector<32x1xf32> to vector<32x128xf32>
    %6 = vector.broadcast %3 : vector<1x128xf32> to vector<32x128xf32>
    %7 = arith.mulf %5, %6 : vector<32x128xf32>
    %c0_4 = arith.constant 0 : index
    %c0_5 = arith.constant 0 : index
    %8 = vector.load %arg4[%c0_4, %c0_5] : memref<32x1xf32, #tpu.memory_space<vmem>>, vector<32x1xf32>
    %9 = vector.broadcast %8 : vector<32x1xf32> to vector<32x128xf32>
    %10 = arith.addf %7, %9 : vector<32x128xf32>
    %11 = math.tanh %10 : vector<32x128xf32>
    %c0_6 = arith.constant 0 : index
    %c0_7 = arith.constant 0 : index
    %12 = vector.load %arg5[%c0_6, %c0_7] : memref<32x32xf32, #tpu.memory_space<vmem>>, vector<32x32xf32>
    %cst = arith.constant dense<0.000000e+00> : vector<32x128xf32>
    %13 = tpu.matmul %12, %11, %cst {dimension_numbers = #tpu.dot_dimension_numbers<[1], [0], [0], [1], [0, 0, 1, 1], [], []>} : vector<32x32xf32>, vector<32x128xf32>, vector<32x128xf32> -> vector<32x128xf32>
    %c0_8 = arith.constant 0 : index
    %c0_9 = arith.constant 0 : index
    %14 = vector.load %arg6[%c0_8, %c0_9] : memref<32x1xf32, #tpu.memory_space<vmem>>, vector<32x1xf32>
    %15 = vector.broadcast %14 : vector<32x1xf32> to vector<32x128xf32>
    %16 = arith.addf %13, %15 : vector<32x128xf32>
    %17 = math.tanh %16 : vector<32x128xf32>
    %c0_10 = arith.constant 0 : index
    %c0_11 = arith.constant 0 : index
    %18 = vector.load %arg7[%c0_10, %c0_11] : memref<32x32xf32, #tpu.memory_space<vmem>>, vector<32x32xf32>
    %cst_12 = arith.constant dense<0.000000e+00> : vector<32x128xf32>
    %19 = tpu.matmul %18, %17, %cst_12 {dimension_numbers = #tpu.dot_dimension_numbers<[1], [0], [0], [1], [0, 0, 1, 1], [], []>} : vector<32x32xf32>, vector<32x128xf32>, vector<32x128xf32> -> vector<32x128xf32>
    %c0_13 = arith.constant 0 : index
    %c0_14 = arith.constant 0 : index
    %20 = vector.load %arg8[%c0_13, %c0_14] : memref<32x1xf32, #tpu.memory_space<vmem>>, vector<32x1xf32>
    %21 = vector.broadcast %20 : vector<32x1xf32> to vector<32x128xf32>
    %22 = arith.addf %19, %21 : vector<32x128xf32>
    %23 = math.tanh %22 : vector<32x128xf32>
    %c0_15 = arith.constant 0 : index
    %c0_16 = arith.constant 0 : index
    %24 = vector.load %arg9[%c0_15, %c0_16] : memref<32x32xf32, #tpu.memory_space<vmem>>, vector<32x32xf32>
    %cst_17 = arith.constant dense<0.000000e+00> : vector<32x128xf32>
    %25 = tpu.matmul %24, %23, %cst_17 {dimension_numbers = #tpu.dot_dimension_numbers<[1], [0], [0], [1], [0, 0, 1, 1], [], []>} : vector<32x32xf32>, vector<32x128xf32>, vector<32x128xf32> -> vector<32x128xf32>
    %c0_18 = arith.constant 0 : index
    %c0_19 = arith.constant 0 : index
    %26 = vector.load %arg10[%c0_18, %c0_19] : memref<32x1xf32, #tpu.memory_space<vmem>>, vector<32x1xf32>
    %27 = vector.broadcast %26 : vector<32x1xf32> to vector<32x128xf32>
    %28 = arith.addf %25, %27 : vector<32x128xf32>
    %29 = math.tanh %28 : vector<32x128xf32>
    %c0_20 = arith.constant 0 : index
    %c0_21 = arith.constant 0 : index
    %30 = vector.load %arg11[%c0_20, %c0_21] : memref<1x32xf32, #tpu.memory_space<vmem>>, vector<1x32xf32>
    %cst_22 = arith.constant dense<0.000000e+00> : vector<1x128xf32>
    %31 = tpu.matmul %30, %29, %cst_22 {dimension_numbers = #tpu.dot_dimension_numbers<[1], [0], [0], [1], [0, 0, 1, 1], [], []>} : vector<1x32xf32>, vector<32x128xf32>, vector<1x128xf32> -> vector<1x128xf32>
    %c0_23 = arith.constant 0 : index
    %c0_24 = arith.constant 0 : index
    %32 = vector.load %arg12[%c0_23, %c0_24] : memref<1x1xf32, #tpu.memory_space<vmem>>, vector<1x1xf32>
    %33 = vector.broadcast %32 : vector<1x1xf32> to vector<1x128xf32>
    %34 = arith.addf %31, %33 : vector<1x128xf32>
    %cst_25 = arith.constant 0.000000e+00 : f32
    %35 = vector.broadcast %cst_25 : f32 to vector<1x128xf32>
    %36 = arith.maximumf %34, %35 : vector<1x128xf32>
    %37 = tpu.iota {dimensions = array<i32: 1>} : vector<1x128xi32>
    %c2_i32 = arith.constant 2 : i32
    %38 = arith.muli %arg0, %c2_i32 : i32
    %39 = arith.addi %38, %arg1 : i32
    %c128_i32 = arith.constant 128 : i32
    %40 = arith.muli %39, %c128_i32 : i32
    %41 = vector.broadcast %40 : i32 to vector<1x128xi32>
    %42 = arith.addi %41, %37 : vector<1x128xi32>
    %c300_i32 = arith.constant 300 : i32
    %43 = vector.broadcast %c300_i32 : i32 to vector<1x128xi32>
    %44 = arith.cmpi slt, %42, %43 : vector<1x128xi32>
    %cst_26 = arith.constant 0.000000e+00 : f32
    %45 = vector.broadcast %cst_26 : f32 to vector<1x128xf32>
    %46 = arith.select %44, %36, %45 : vector<1x128xi1>, vector<1x128xf32>
    %c0_27 = arith.constant 0 : index
    %c0_28 = arith.constant 0 : index
    %47 = vector.load %arg13[%c0_27, %c0_28] : memref<1x128xf32, #tpu.memory_space<vmem>>, vector<1x128xf32>
    %48 = arith.addf %47, %46 : vector<1x128xf32>
    %c0_29 = arith.constant 0 : index
    %c0_30 = arith.constant 0 : index
    %49 = vector.load %arg13[%c0_29, %c0_30] : memref<1x128xf32, #tpu.memory_space<vmem>>, vector<1x128xf32>
    tpu.vector_store %arg13[%c0_29, %c0_30], %48 {strides = array<i32>} : memref<1x128xf32, #tpu.memory_space<vmem>>, vector<1x128xf32>,
    return
  }
  func.func @transform_0(%arg0: i32, %arg1: i32) -> (i32, i32) {
    %c2_i32 = arith.constant 2 : i32
    %0 = arith.muli %arg0, %c2_i32 : i32
    %1 = arith.addi %0, %arg1 : i32
    %c0_i32 = arith.constant 0 : i32
    %c0_i32_0 = arith.constant 0 : i32
    return %c0_i32, %1 : i32, i32
  }
  func.func @transform_1(%arg0: i32, %arg1: i32) -> (i32, i32) {
    %c0_i32 = arith.constant 0 : i32
    %c0_i32_0 = arith.constant 0 : i32
    %c0_i32_1 = arith.constant 0 : i32
    return %c0_i32, %c0_i32_0 : i32, i32
  }
  func.func @transform_2(%arg0: i32, %arg1: i32) -> (i32, i32) {
    %c0_i32 = arith.constant 0 : i32
    %c0_i32_0 = arith.constant 0 : i32
    %c0_i32_1 = arith.constant 0 : i32
    return %c0_i32, %c0_i32_0 : i32, i32
  }
  func.func @transform_3(%arg0: i32, %arg1: i32) -> (i32, i32) {
    %c0_i32 = arith.constant 0 : i32
    %c0_i32_0 = arith.constant 0 : i32
    %c0_i32_1 = arith.constant 0 : i32
    return %c0_i32, %c0_i32_0 : i32, i32
  }
  func.func @transform_4(%arg0: i32, %arg1: i32) -> (i32, i32) {
    %c0_i32 = arith.constant 0 : i32
    %c0_i32_0 = arith.constant 0 : i32
    %c0_i32_1 = arith.constant 0 : i32
    return %c0_i32, %c0_i32_0 : i32, i32
  }
  func.func @transform_5(%arg0: i32, %arg1: i32) -> (i32, i32) {
    %c0_i32 = arith.constant 0 : i32
    %c0_i32_0 = arith.constant 0 : i32
    %c0_i32_1 = arith.constant 0 : i32
    return %c0_i32, %c0_i32_0 : i32, i32
  }
  func.func @transform_6(%arg0: i32, %arg1: i32) -> (i32, i32) {
    %c0_i32 = arith.constant 0 : i32
    %c0_i32_0 = arith.constant 0 : i32
    %c0_i32_1 = arith.constant 0 : i32
    return %c0_i32, %c0_i32_0 : i32, i32
  }
  func.func @transform_7(%arg0: i32, %arg1: i32) -> (i32, i32) {
    %c0_i32 = arith.constant 0 : i32
    %c0_i32_0 = arith.constant 0 : i32
    %c0_i32_1 = arith.constant 0 : i32
    return %c0_i32, %c0_i32_0 : i32, i32
  }
  func.func @transform_8(%arg0: i32, %arg1: i32) -> (i32, i32) {
    %c0_i32 = arith.constant 0 : i32
    %c0_i32_0 = arith.constant 0 : i32
    %c0_i32_1 = arith.constant 0 : i32
    return %c0_i32, %c0_i32_0 : i32, i32
  }
  func.func @transform_9(%arg0: i32, %arg1: i32) -> (i32, i32) {
    %c0_i32 = arith.constant 0 : i32
    %c0_i32_0 = arith.constant 0 : i32
    %c0_i32_1 = arith.constant 0 : i32
    return %c0_i32, %c0_i32_0 : i32, i32
  }
  func.func @transform_10(%arg0: i32, %arg1: i32) -> (i32, i32) {
    %c0_i32 = arith.constant 0 : i32
    %c0_i32_0 = arith.constant 0 : i32
    %c0_i32_1 = arith.constant 0 : i32
    return %c0_i32, %c0_i32_0 : i32, i32
  }
  func.func @transform_11(%arg0: i32, %arg1: i32) -> (i32, i32) {
    %c0_i32 = arith.constant 0 : i32
    %c0_i32_0 = arith.constant 0 : i32
    return %c0_i32, %arg0 : i32, i32
  }
}

</mosaic_0001>

<bundles_post_ra>
// kernel: tpu_custom_call.1
= control target key start
LH: loop header
LB: loop body
LE: loop exit
PB: predicated region body
PF: predicated region fallthrough
CT: control target
= control target key end

     0   :  { %s1722_s0 = inlined_call_operand.vmem [shape: f32[1,512], index: 0, kind: input, shape index: {}]   ;;  %s1723_s1 = inlined_call_operand.vmem [shape: f32[32,1], index: 1, kind: input, shape index: {}]   ;;  %s1724_s2 = inlined_call_operand.vmem [shape: f32[32,1], index: 2, kind: input, shape index: {}]   ;;  %s1725_s3 = inlined_call_operand.vmem [shape: f32[32,32], index: 3, kind: input, shape index: {}]   ;;  %s1726_s4 = inlined_call_operand.vmem [shape: f32[32,1], index: 4, kind: input, shape index: {}]   ;;  %s1727_s5 = inlined_call_operand.vmem [shape: f32[32,32], index: 5, kind: input, shape index: {}]   ;;  %s1728_s6 = inlined_call_operand.vmem [shape: f32[32,1], index: 6, kind: input, shape index: {}]   ;;  %s1729_s7 = inlined_call_operand.vmem [shape: f32[32,32], index: 7, kind: input, shape index: {}]   ;;  %s1730_s8 = inlined_call_operand.vmem [shape: f32[32,1], index: 8, kind: input, shape index: {}]   ;;  %s1731_s9 = inlined_call_operand.vmem [shape: f32[1,32], index: 9, kind: input, shape index: {}]   ;;  %s1732_s10 = inlined_call_operand.<no memory space> [shape: f32[1,1], index: 10, kind: input, shape index: {}]   ;;  %s1733_s11 = inlined_call_operand.hbm [shape: f32[1,256], index: 11, kind: output, shape index: {}]  }
   0x1   :  { %v16_v0 = vstv %s1732_s10 }
   0x2   :  { %17 = vst [vmem:[#allocation2] sm:$0x1] %v16_v0 }
   0x3   :  { %18 = vsyncpa [#allocation4], 0 }
   0x4   :  { %20 = vsyncpa [#allocation4 + $0x1], 0  ;;  %s1454_s19 = smov 0   ;;  %s1456_s20 = smov 0  }
   0x5   :  { %s1458_s21 = smov 0   ;;  %s1460_s22 = smov 0  }
   0x6   :  { %s1462_s23 = smov 0   ;;  %s1464_s24 = smov 0  }
   0x7   :  { %s1466_s25 = smov 0   ;;  %s1468_s26 = smov 0  }
   0x8 LB: > { %1738 = sst [smem:[#allocation6_spill]] %s1375_s24  ;;  %s1039_s10 = sadd.s32 4294967295, %s1383_s26   ;;  %s1383_s26 = sphi %s1468_s26, %s26_s26   ;;  %s1379_s25 = sphi %s1466_s25, %s1751_s25   ;;  %s1375_s24 = sphi %s1464_s24, %s1750_s24   ;;  %s1371_s23 = sphi %s1462_s23, %s1749_s23   ;;  %s1367_s22 = sphi %s1460_s22, %s1748_s22   ;;  %s1363_s21 = sphi %s1458_s21, %s1754_s21   ;;  %s1359_s20 = sphi %s1456_s20, %s1753_s20   ;;  %s1355_s19 = sphi %s1454_s19, %s1752_s19  }
   0x9   : > { %1739 = sst [smem:[#allocation7_spill]] %s1379_s25  ;;  %s1040_s27 = sadd.s32 4294967294, %s1383_s26  }
   0xa   : > { %s35_s28 = sadd.s32 1, %s1375_s24  ;;  %s38_s29 = sadd.s32 1, %s1379_s25 }
   0xb   : > { %p36_p0 = scmp.ge.s32.totalorder %s35_s28, 2  ;;  %p295_p1 = scmp.ne.s32.totalorder %s1363_s21, %s1359_s20 }
   0xc   : > { %p296_p2 = scmp.eq.s32.totalorder %s1039_s10, 3  ;;  %p301_p4 = scmp.ne.s32.totalorder %s1359_s20, %s1355_s19 }
   0xd   : > { %s1756_s28 = smov (%p36_p0, %s35_s28), 0  ;;  %s1758_s29 = smov (!%p36_p0, %s38_s29), %s1379_s25 }
   0xe   : > { %1740 = sst [smem:[#allocation8_spill]] %s1756_s28  ;;  %p1503_p3 = por %p296_p2, %p295_p1 }
   0xf   : > { %p40_p5 = scmp.ge.s32.totalorder %s1758_s29, 2  ;;  %p302_p6 = scmp.eq.s32.totalorder %s1040_s27, 3 }
  0x10   : > { %p1045_p7 = scmp.ge.s32.totalorder %s1383_s26, 1  ;;  %p360_p8 = scmp.lt.s32.totalorder %s1383_s26, 5 }
  0x11   : > { %s1760_s29 = smov (%p40_p5, %s1758_s29), 0  ;;  %p1513_p9 = por %p302_p6, %p301_p4 }
  0x12   : > { %1742 = sst [smem:[#allocation9_spill]] %s1760_s29  ;;  %p361_p10 = pnand %p1045_p7, %p360_p8 }
  0x13   : > { %s282_s13 = ssub.s32 %s1379_s25, %s1760_s29  ;;  %s285_s14 = sadd.s32 1, %s1363_s21 }
  0x14   : > { %p283_p11 = scmp.eq.s32.totalorder %s282_s13, 0  ;;  %364 = sbr.rel (%p361_p10) target bundleno = 1137 (0x471), region = 64 }
  0x15   : > { %s1737_s16 = sand.u32 (!%p361_p10), 1, %s1359_s20   ;;  %s1046_s17 = sshll.u32 (!%p361_p10), %s1371_s23, 1 }
  0x16   : > { %s1521_s15 = scalar_select %p283_p11, %s1363_s21, %s285_s14  }
  0x17   : > { %s1526_s18 = sadd.s32 (!%p361_p10), %s1367_s22, %s1046_s17  ;;  %s1538_s14 = scalar_lea.vmem (!%p361_p10), [#allocation3], %s1737_s16 }
  0x18   : > { %1744 = sst [smem:[#allocation10_spill]] %s1521_s15  ;;  %p401_p12 = scmp.lt.s32.totalorder (!%p361_p10), %s1526_s18, 3 }
  0x19   : > { %p1047_p13 = scmp.ne.s32.totalorder (!%p361_p10), %s1367_s22, 0 }
  0x1b   : > { %s1530_s10 = scalar_select %p401_p12, %s1526_s18, 3 }
  0x1c   : > { %409 = sbr.rel (%p1047_p13) target bundleno = 35 (0x23), region = 68  ;;  %v1385_v1 = vmov (!%p1047_p13), 0.0  }
  0x1d   : > { %410 = vst [vmem:[%s1538_s14] sm:$0x1] (!%p1047_p13), %v1385_v1 }
  0x23 PF: > { %v446_v2 = vld [vmem:[%s1724_s2] sm:$0xff]  ;;  %v1386_v4 = vmov 0   ;;  %v447_v5 = vld [vmem:[%s1724_s2 + $0x8] sm:$0xff]  ;;  %v415_v7 = vld [vmem:[%s1723_s1 + $0x18] sm:$0xff]  ;;  %vm506_vm0 = vcmask 261120   ;;  %s1745_s29 = scalar_lea.vmem %s1722_s0, %s1530_s10  ;;  %vm1388_vm1 = vmmov 0  }
  0x24   : > { %v412_v3 = vld [vmem:[%s1723_s1] sm:$0xff]  ;;  %1256 = vset.pattern.permute.xlu1 %v1386_v4  ;;  %1255 = vset.pattern.permute.xlu0 %v1386_v4  ;;  %v413_v6 = vld [vmem:[%s1723_s1 + $0x8] sm:$0xff]  ;;  %v414_v8 = vld [vmem:[%s1723_s1 + $0x10] sm:$0xff]  ;;  %s1063_s16 = sshll.u32 %s1526_s18, 7  ;;  %s1064_s27 = sshll.u32 %s1371_s23, 4 }
  0x25   : > { %452 = vperm.xlu1 %1256, %v446_v2   ;;  %418 = vperm.xlu0 %1255, %v412_v3   ;;  %v449_v9 = vld [vmem:[%s1724_s2 + $0x18] sm:$0xff]  ;;  %v448_v10 = vld [vmem:[%s1724_s2 + $0x10] sm:$0xff]  ;;  %v483_v11 = vld [vmem:[%s1726_s4 + $0x8] sm:$0xff]  ;;  %s976_s28 = sshll.u32 %s1538_s14, 4  ;;  %s1666_s24 = scalar_lea.hbm %s1733_s11, %s1064_s27  ;;  %s1668_s28 = int_to_ptr.vmem [resolvable:$true] %s976_s28 }
  0x26   : > { %v482_v12 = vld [vmem:[%s1726_s4] sm:$0xff]  ;;  %v485_v13 = vld [vmem:[%s1726_s4 + $0x18] sm:$0xff]  ;;  %v484_v14 = vld [vmem:[%s1726_s4 + $0x10] sm:$0xff]  ;;  %s1746_s25 = sand.u32 1, %s1359_s20   ;;  %s1289_s13 = scalar_lea.vmem %s1668_s28, 16 }
  0x27   : > { %v613_v15 = vld [vmem:[%s1728_s6 + $0x8] sm:$0xff]  ;;  %v612_v16 = vld [vmem:[%s1728_s6] sm:$0xff]  ;;  %v615_v17 = vld [vmem:[%s1728_s6 + $0x18] sm:$0xff]  ;;  %s964_s15 = scalar_lea.sflag [#allocation4], %s1746_s25  ;;  %p1290_p0 = scmp.ne.s32.totalorder %s1668_s28, %s1289_s13 }
  0x28   : > { %v614_v18 = vld [vmem:[%s1728_s6 + $0x10] sm:$0xff]  ;;  %v742_v19 = vld [vmem:[%s1730_s8 + $0x8] sm:$0xff]  ;;  %v741_v20 = vld [vmem:[%s1730_s8] sm:$0xff]  ;;  %s1390_s23 = smov [#allocation3]  }
  0x29   : > { %457 = vperm.xlu1 %1256, %v447_v5   ;;  %423 = vperm.xlu0 %1255, %v413_v6   ;;  %v478_v21 = vld [vmem:[%s1725_s3] sm:$0xff]  ;;  %v744_v22 = vld [vmem:[%s1730_s8 + $0x18] sm:$0xff]  ;;  %v743_v23 = vld [vmem:[%s1730_s8 + $0x10] sm:$0xff]  ;;  %p1291_p1 = pnand %p1290_p0, %p1503_p3 }
  0x2a   : > { %1104 = vmatprep.mubr.msk.f32.mxu0 %vm506_vm0, %v478_v21  ;;  %v867_v24 = vld [vmem:[#allocation2] sm:$0x1]  ;;  %v479_v48 = vld [vmem:[%s1725_s3 + $0x8] sm:$0xff]  ;;  %v480_v49 = vld [vmem:[%s1725_s3 + $0x10] sm:$0xff] }
  0x2b   : > { %v1048_v25 = vld [vmem:[%s1745_s29] ss:$0 sm:$0xff]  ;;  %v481_v50 = vld [vmem:[%s1725_s3 + $0x18] sm:$0xff]  ;;  %v609_v6 = vld [vmem:[%s1727_s5 + $0x8] sm:$0xff]  ;;  %p1292_p2 = pneg %p1291_p1  ;;  %s1293_s29 = sshll.u32 %s1390_s23, 4  ;;  %s1294_s29 = int_to_ptr.vmem [resolvable:$false] %s1293_s29 }
  0x2c   : > { %v608_v51 = vld [vmem:[%s1727_s5] sm:$0xff]  ;;  %s1295_s10 = scalar_lea.vmem %s1294_s29, 32  ;;  %p1296_p4 = scmp.lt.s32.totalorder %s1668_s28, %s1294_s29 }
  0x2d   : > { %433 = vperm.xlu1 %1256, %v415_v7   ;;  %428 = vperm.xlu0 %1255, %v414_v8   ;;  %v610_v7 = vld [vmem:[%s1727_s5 + $0x10] sm:$0xff]  ;;  %v611_v8 = vld [vmem:[%s1727_s5 + $0x18] sm:$0xff]  ;;  %p1297_p5 = scmp.lt.s32.totalorder %s1295_s10, %s1289_s13 }
  0x2e   : > { %1118 = vmatprep.mubr.msk.f32.mxu1 %vm506_vm0, %v608_v51  ;;  %v866_v51 = vld [vmem:[%s1731_s9] sm:$0x1] }
  0x2f   : > { %p1298_p6 = por %p1297_p5, %p1296_p4 }
  0x31   : > { %467 = vperm.xlu1 %1256, %v449_v9   ;;  %462 = vperm.xlu0 %1255, %v448_v10   ;;  %v737_v9 = vld [vmem:[%s1729_s7] sm:$0xff]  ;;  %p1299_p7 = pnand %p1298_p6, %p1292_p2 }
  0x35   : > { %493 = vperm.xlu1 %1256, %v483_v11   ;;  %488 = vperm.xlu0 %1255, %v482_v12  }
  0x39   : > { %503 = vperm.xlu1 %1256, %v485_v13   ;;  %498 = vperm.xlu0 %1255, %v484_v14  }
  0x3d   : > { %623 = vperm.xlu1 %1256, %v613_v15   ;;  %618 = vperm.xlu0 %1255, %v612_v16  }
  0x41   : > { %633 = vperm.xlu1 %1256, %v615_v17   ;;  %628 = vperm.xlu0 %1255, %v614_v18  }
  0x45   : > { %752 = vperm.xlu1 %1256, %v742_v19   ;;  %747 = vperm.xlu0 %1255, %v741_v20  }
  0x49   : > { %762 = vperm.xlu1 %1256, %v744_v22   ;;  %757 = vperm.xlu0 %1255, %v743_v23  }
  0x4d   : > { %870 = vperm.xlu0 %1255, %v867_v24  }
  0xa4   : > { %v453_v26 = vpop.permute.xlu1 %452  ;;  %v419_v27 = vpop.permute.xlu0 %418 }
  0xa5   : > { %v442_v28 = vmul.f32 %v1048_v25, %v419_v27 }
  0xa7   : > { %v470_v29 = vadd.f32 %v453_v26, %v442_v28  ;;  %v738_v28 = vld [vmem:[%s1729_s7 + $0x8] sm:$0xff] }
  0xa8   : > { %v458_v30 = vpop.permute.xlu1 %457  ;;  %v424_v31 = vpop.permute.xlu0 %423 }
  0xa9   : > { %v443_v32 = vmul.f32 %v1048_v25, %v424_v31  ;;  %1257 = vtanh.f32 %v470_v29  ;;  %v739_v29 = vld [vmem:[%s1729_s7 + $0x10] sm:$0xff]  ;;  %v1387_v31 = vmov 0.0|0.0  }
  0xab   : > { %v471_v33 = vadd.f32 %v458_v30, %v443_v32  ;;  %v740_v30 = vld [vmem:[%s1729_s7 + $0x18] sm:$0xff]  ;;  %v1389_v32 = vmov 0.0  }
  0xac   : > { %v434_v34 = vpop.permute.xlu1 %433  ;;  %v429_v35 = vpop.permute.xlu0 %428 }
  0xad   : > { %1259 = vtanh.f32 %v471_v33  ;;  %v445_v36 = vmul.f32 %v1048_v25, %v434_v34  ;;  %v444_v37 = vmul.f32 %v1048_v25, %v429_v35 }
  0xb0   : > { %v468_v38 = vpop.permute.xlu1 %467  ;;  %v463_v39 = vpop.permute.xlu0 %462 }
  0xb1   : > { %v473_v40 = vadd.f32 %v468_v38, %v445_v36  ;;  %v472_v41 = vadd.f32 %v463_v39, %v444_v37 }
  0xb3   : > { %1261 = vtanh.f32 %v473_v40  ;;  %v1258_v42 = vpop.eup %1257 }
  0xb4   : > { %1263 = vtanh.f32 %v472_v41  ;;  %v494_v52 = vpop.permute.xlu1 %493  ;;  %v489_v53 = vpop.permute.xlu0 %488 }
  0xb7   : > { %v1260_v43 = vpop.eup %1259 }
  0xb8   : > { %v1149_v44 = vpack.c.bf16 %v1260_v43, %v1258_v42  ;;  %v504_v58 = vpop.permute.xlu1 %503  ;;  %v499_v60 = vpop.permute.xlu0 %498 }
  0xba   : > { %1150 = vmatprep.subr.bf16.mxu0 %v1149_v44 }
  0xbb   : > { %1152 = vmatpush3.bf16.msra.mxu0 %v1149_v44 }
  0xbc   : > { %v624_v10 = vpop.permute.xlu1 %623  ;;  %v619_v11 = vpop.permute.xlu0 %618 }
  0xbd   : > { %v1262_v45 = vpop.eup %1261 }
  0xbe   : > { %v1264_v46 = vpop.eup %1263 }
  0xbf   : > { %v1153_v47 = vpack.c.bf16 %v1262_v45, %v1264_v46 }
  0xc0   : > { %v634_v16 = vpop.permute.xlu1 %633  ;;  %v629_v18 = vpop.permute.xlu0 %628 }
  0xc1   : > { %1154 = vmatprep.subr.bf16.mxu0 %v1153_v47 }
  0xc2   : > { %1156 = vmatpush3.bf16.msra.mxu0 %v1153_v47 }
  0xc4   : > { %v753_v33 = vpop.permute.xlu1 %752  ;;  %v748_v34 = vpop.permute.xlu0 %747 }
  0xc5   : > { %1105 = vmatmul.mubr.msk.f32.vlgmr.msra.gmra.mrb[0].mxu0 %vm506_vm0, %v479_v48 }
  0xc6   : > { %1107 = vmatprep.mubr.msk.f32.mxu0 %vm506_vm0, %v480_v49 }
  0xc8   : > { %v763_v39 = vpop.permute.xlu1 %762  ;;  %v758_v41 = vpop.permute.xlu0 %757 }
  0xc9   : > { %1108 = vmatmul.mubr.msk.f32.gmra.mrb[2].mxu0 %vm506_vm0, %v481_v50 }
  0xca   : > { %1132 = vmatprep.mubr.msk.f32.mxu0 %vm506_vm0, %v737_v9 }
 0x198   : > { %v1106_v54 = vpop.f32.mrb[0].mxu0 }
 0x199   : > { %v591_v55 = vadd.f32 %v1106_v54, %v494_v52  ;;  %v585_v56 = vpop.f32.mrb[1].mxu0  ;;  %v873_v52 = vlaneseq }
 0x19a   : > { %v586_v57 = vadd.f32 %v585_v56, %v489_v53  ;;  %v956_v56 = vstv %s1063_s16 }
 0x19b   : > { %1265 = vtanh.f32 %v591_v55  ;;  %v874_v53 = vshrl.u32 %v873_v52, 7  ;;  %v952_v54 = vand.u32 127, %v873_v52 }
 0x19c   : > { %1267 = vtanh.f32 %v586_v57  ;;  %v1109_v59 = vpop.f32.mrb[2].mxu0  ;;  %v871_v57 = vpop.permute.xlu0 %870 }
 0x19d   : > { %v601_v61 = vadd.f32 %v1109_v59, %v504_v58  ;;  %v595_v62 = vpop.f32.mrb[3].mxu0  ;;  %v875_v55 = vsub.s32 0, %v874_v53  ;;  %v957_v58 = vadd.s32 %v956_v56, %v952_v54 }
 0x19e   : > { %v596_v63 = vadd.f32 %v595_v62, %v499_v60 }
 0x19f   : > { %1269 = vtanh.f32 %v601_v61  ;;  %v876_v59 = vrot.slane %v871_v57, %v875_v55  ;;  %vm958_vm2 = vcmp.lt.s32.totalorder %v957_v58, 300 }
 0x1a0   : > { %1271 = vtanh.f32 %v596_v63 }
 0x1a5   : > { %v1266_v0 = vpop.eup %1265 }
 0x1a6   : > { %v1268_v1 = vpop.eup %1267 }
 0x1a7   : > { %v1157_v2 = vpack.c.bf16 %v1266_v0, %v1268_v1  ;;  %v960_v0 = vld [vmem:[%s1538_s14] sm:$0x1] }
 0x1a9   : > { %v1270_v3 = vpop.eup %1269  ;;  %1158 = vmatprep.subr.bf16.mxu1 %v1157_v2 }
 0x1aa   : > { %v1272_v4 = vpop.eup %1271  ;;  %1160 = vmatpush3.bf16.msra.mxu1 %v1157_v2 }
 0x1ab   : > { %v1161_v5 = vpack.c.bf16 %v1270_v3, %v1272_v4 }
 0x1ad   : > { %1162 = vmatprep.subr.bf16.mxu1 %v1161_v5 }
 0x1ae   : > { %1164 = vmatpush3.bf16.msra.mxu1 %v1161_v5 }
 0x1af   : > { %1173 = vmatprep.subr.bf16.mxu1 %v1387_v31 }
 0x1b1   : > { %1119 = vmatmul.mubr.msk.f32.vlgmr.msra.gmra.mrb[0].mxu1 %vm506_vm0, %v609_v6 }
 0x1b2   : > { %1121 = vmatprep.mubr.msk.f32.mxu1 %vm506_vm0, %v610_v7 }
 0x1b5   : > { %1122 = vmatmul.mubr.msk.f32.gmra.mrb[2].mxu1 %vm506_vm0, %v611_v8 }
 0x1b6   : > { %1146 = vmatprep.mubr.msk.f32.mxu1 %vm1388_vm1, %v1389_v32 }
 0x284   : > { %v1120_v12 = vpop.f32.mrb[0].mxu1 }
 0x285   : > { %v720_v13 = vadd.f32 %v1120_v12, %v624_v10  ;;  %v714_v14 = vpop.f32.mrb[1].mxu1 }
 0x286   : > { %v715_v15 = vadd.f32 %v714_v14, %v619_v11 }
 0x287   : > { %1273 = vtanh.f32 %v720_v13 }
 0x288   : > { %1275 = vtanh.f32 %v715_v15  ;;  %v1123_v17 = vpop.f32.mrb[2].mxu1 }
 0x289   : > { %v730_v19 = vadd.f32 %v1123_v17, %v634_v16  ;;  %v724_v20 = vpop.f32.mrb[3].mxu1 }
 0x28a   : > { %v725_v21 = vadd.f32 %v724_v20, %v629_v18 }
 0x28b   : > { %1277 = vtanh.f32 %v730_v19 }
 0x28c   : > { %1279 = vtanh.f32 %v725_v21 }
 0x291   : > { %v1274_v22 = vpop.eup %1273 }
 0x292   : > { %v1276_v23 = vpop.eup %1275 }
 0x293   : > { %v1165_v24 = vpack.c.bf16 %v1274_v22, %v1276_v23 }
 0x295   : > { %v1278_v25 = vpop.eup %1277  ;;  %1166 = vmatprep.subr.bf16.mxu0 %v1165_v24 }
 0x296   : > { %v1280_v26 = vpop.eup %1279  ;;  %1168 = vmatpush3.bf16.msra.mxu0 %v1165_v24 }
 0x297   : > { %v1169_v27 = vpack.c.bf16 %v1278_v25, %v1280_v26 }
 0x299   : > { %1170 = vmatprep.subr.bf16.mxu0 %v1169_v27 }
 0x29a   : > { %1172 = vmatpush3.bf16.msra.mxu0 %v1169_v27 }
 0x29d   : > { %1133 = vmatmul.mubr.msk.f32.vlgmr.msra.gmra.mrb[4].mxu0 %vm506_vm0, %v738_v28 }
 0x29e   : > { %1135 = vmatprep.mubr.msk.f32.mxu0 %vm506_vm0, %v739_v29 }
 0x2a1   : > { %1136 = vmatmul.mubr.msk.f32.gmra.mrb[6].mxu0 %vm506_vm0, %v740_v30 }
 0x370   : > { %v1134_v35 = vpop.f32.mrb[4].mxu0 }
 0x371   : > { %v849_v36 = vadd.f32 %v1134_v35, %v753_v33  ;;  %v843_v37 = vpop.f32.mrb[5].mxu0 }
 0x372   : > { %v844_v38 = vadd.f32 %v843_v37, %v748_v34 }
 0x373   : > { %1281 = vtanh.f32 %v849_v36 }
 0x374   : > { %1283 = vtanh.f32 %v844_v38  ;;  %v1137_v40 = vpop.f32.mrb[6].mxu0 }
 0x375   : > { %v859_v42 = vadd.f32 %v1137_v40, %v763_v39  ;;  %v853_v43 = vpop.f32.mrb[7].mxu0 }
 0x376   : > { %v854_v44 = vadd.f32 %v853_v43, %v758_v41 }
 0x377   : > { %1285 = vtanh.f32 %v859_v42 }
 0x378   : > { %1287 = vtanh.f32 %v854_v44 }
 0x37d   : > { %v1282_v45 = vpop.eup %1281 }
 0x37e   : > { %v1284_v46 = vpop.eup %1283 }
 0x37f   : > { %v1174_v47 = vpack.c.bf16 %v1282_v45, %v1284_v46 }
 0x381   : > { %v1286_v48 = vpop.eup %1285  ;;  %1175 = vmatpush3.bf16.msra.mxu1 %v1174_v47 }
 0x382   : > { %v1288_v49 = vpop.eup %1287  ;;  %1176 = vmatprep.subr.bf16.mxu1 %v1387_v31 }
 0x383   : > { %v1177_v50 = vpack.c.bf16 %v1286_v48, %v1288_v49 }
 0x385   : > { %1178 = vmatpush3.bf16.msra.mxu1 %v1177_v50 }
 0x388   : > { %1147 = vmatmul.mubr.msk.f32.vlgmr.msra.gmra.mrb[4].mxu1 %vm506_vm0, %v866_v51 }
 0x45b   : > { %v946_v60 = vpop.f32.mrb[4].mxu1 }
 0x45c   : > { %v947_v61 = vadd.f32 %v946_v60, %v876_v59  ;;  %v1148_v62 = vpop.f32.mrb[5].mxu1 }
 0x45e   : > { %v950_v63 = vmax.f32 %v947_v61, 0.0 }
 0x460   : > { %v959_v1 = vsel %vm958_vm2, %v950_v63, 0.0 }
 0x461   : > { %v961_v2 = vadd.f32 %v960_v0, %v959_v1 }
 0x463   : > { %962 = vst [vmem:[%s1538_s14] sm:$0x1] %v961_v2 }
 0x464   : > { %1302 = shalt.err (!%p1299_p7)
}
 0x465   : > { %s1303_s14 = scalar_lea.hbm %s1666_s24, 16  ;;  %s1307_s27 = scalar_lea.hbm %s1733_s11, 32 }
 0x466   : > { %p1304_p8 = scmp.ne.s32.totalorder %s1666_s24, %s1303_s14  ;;  %p1308_p12 = scmp.lt.u32.totalorder %s1666_s24, %s1733_s11 }
 0x467   : > { %p1309_p13 = scmp.lt.u32.totalorder %s1307_s27, %s1303_s14  ;;  %p1311_p1 = scmp.lt.u32.totalorder %s1303_s14, %s1666_s24 }
 0x468   : > { %p1305_p10 = pnand %p1304_p8, %p1503_p3 }
 0x469   : > { %p1310_p0 = por %p1309_p13, %p1308_p12 }
 0x46a   : > { %p1306_p11 = pneg %p1305_p10 }
 0x46b   : > { %p1312_p2 = por %p1311_p1, %p1310_p0 }
 0x46d   : > { %p1313_p4 = pnand %p1312_p2, %p1306_p11 }
 0x46f   : > { %1316 = shalt.err (!%p1313_p4)
}
 0x470   : > { %1179 = dma.vmem_to_hbm [thread:$0]  (%p1503_p3), %s1668_s28, 16, %s1666_s24, %s964_s15  }
 0x471 PF: > { %p1185_p5 = scmp.ge.s32.totalorder %s1383_s26, 2  ;;  %s988_s25 = sand.u32 1, %s1355_s19  }
 0x472   : > { %s989_s13 = scalar_lea.sflag [#allocation4], %s988_s25 }
 0x473   : > { %p1182_p6 = pnand %p1185_p5, %p1513_p9 }
 0x475   : > { %1350 = dma.done.wait (!%p1182_p6), %s989_s13, 16  }
 0x476   : > { %1352 = vsyncadd (!%p1182_p6), %s989_s13, 4294967280  ;;  %s26_s26 = sadd.s32 1, %s1383_s26   ;;  %s1747_s30 = sld [smem:[#allocation10_spill]] }
 0x477   : > { %p23_p7 = scmp.ge.s32.totalorder %s26_s26, 6   ;;  %s1748_s22 = sld [smem:[#allocation6_spill]] }
 0x478   : > { %s1749_s23 = sld [smem:[#allocation7_spill]]  ;;  %s1750_s24 = sld [smem:[#allocation8_spill]] }
 0x479   : > { %s1751_s25 = sld [smem:[#allocation9_spill]]  ;;  %s1752_s19 = smov %s1359_s20 }
 0x47a   : > { %s1753_s20 = smov %s1363_s21  ;;  %25 = sbr.rel (!%p23_p7) target bundleno = 8 (0x8), region = 103 }
 0x47c   : > { %s1754_s21 = smov %s1747_s30 }
 0x481   :  { %993 = vsyncpa [#allocation4], 1 }
 0x482   :  { %995 = vsyncpa [#allocation4 + $0x1], 1 }

</bundles_post_ra>
